<compile_context>
chip_gen: v6e
topology: v6e:2x2x1
jax: 0.10.0
libtpu: 0.0.40
codegen_flags: <defaults>
</compile_context>

<pallas_src>
import functools

import jax
import jax.numpy as jnp
from jax import lax
from jax.experimental import pallas as pl
from jax.experimental.pallas import tpu as pltpu


def _ccc_loss_kernel(pred_ref, gt_ref, out_ref,
                     sp_ref, sg_ref, spp_ref, sgg_ref, spg_ref,
                     *, n_rows, d):
    """One (TN, D) tile per grid step; accumulate 5 raw moments; finalize at end."""
    i = pl.program_id(0)

    @pl.when(i == 0)
    def _init():
        sp_ref[...] = jnp.zeros_like(sp_ref)
        sg_ref[...] = jnp.zeros_like(sg_ref)
        spp_ref[...] = jnp.zeros_like(spp_ref)
        sgg_ref[...] = jnp.zeros_like(sgg_ref)
        spg_ref[...] = jnp.zeros_like(spg_ref)

    p = pred_ref[...].astype(jnp.float32)   # (TN, D)
    g = gt_ref[...].astype(jnp.float32)     # (TN, D)

    # Five axis-0 (sublane) reductions -- the only full-tile work per step.
    sp_ref[...] += jnp.sum(p, axis=0, keepdims=True)
    sg_ref[...] += jnp.sum(g, axis=0, keepdims=True)
    spp_ref[...] += jnp.sum(p * p, axis=0, keepdims=True)
    sgg_ref[...] += jnp.sum(g * g, axis=0, keepdims=True)
    spg_ref[...] += jnp.sum(p * g, axis=0, keepdims=True)

    @pl.when(i == pl.num_programs(0) - 1)
    def _finalize():
        n_f = jnp.float32(n_rows)
        total_f = jnp.float32(n_rows * d)

        mean_p = sp_ref[...] / n_f                     # (1, D)
        mean_g = sg_ref[...] / n_f                     # (1, D)

        # Per-column centered sums of squares / cross products.
        css_pp = spp_ref[...] - n_f * mean_p * mean_p  # (1, D)
        css_gg = sgg_ref[...] - n_f * mean_g * mean_g  # (1, D)
        css_pg = spg_ref[...] - n_f * mean_p * mean_g  # (1, D)

        inv_nm1 = 1.0 / (n_f - 1.0)
        var_p = css_pp * inv_nm1                       # unbiased var(pred, 0)
        var_g = css_gg * inv_nm1                       # unbiased var(gt, 0)

        # Scalar correlation terms: sums of the centered per-column quantities.
        s_pp = jnp.sum(css_pp)
        s_gg = jnp.sum(css_gg)
        s_pg = jnp.sum(css_pg)
        cor = s_pg * lax.rsqrt(s_pp * s_gg)            # EUP rsqrt, no divides

        # Global (all-element) unbiased stds from the same moments.
        sum_p_all = jnp.sum(sp_ref[...])
        sum_g_all = jnp.sum(sg_ref[...])
        sum_pp_all = jnp.sum(spp_ref[...])
        sum_gg_all = jnp.sum(sgg_ref[...])
        mean_p_all = sum_p_all / total_f
        mean_g_all = sum_g_all / total_f
        inv_tm1 = 1.0 / (total_f - 1.0)
        sd_p = jnp.sqrt((sum_pp_all - total_f * mean_p_all * mean_p_all) * inv_tm1)
        sd_g = jnp.sqrt((sum_gg_all - total_f * mean_g_all * mean_g_all) * inv_tm1)

        numerator = 2.0 * cor * sd_g * sd_p            # scalar
        diff = mean_g - mean_p
        denominator = var_g + var_p + diff * diff      # (1, D)
        out_ref[...] = 1.0 - numerator / denominator


def _round_up(x, m):
    return ((x + m - 1) // m) * m


def ccc_loss(prediction, ground_truth, *, tile_n=512):
    """prediction, ground_truth: (N, D) float32/bf16.  Returns (D,) float32."""
    assert prediction.shape == ground_truth.shape
    n, d = prediction.shape

    # Tile sizing: 2 inputs x 2 pipeline buffers x (tn, d) f32 must stay under
    # ~32 MiB so the kernel fits comfortably on v7x (64 MiB VMEM) as well as
    # v5e/v6e (128 MiB).  Keep tn a multiple of 8 (sublane constraint) and never
    # bigger than the (8-rounded) input height.
    budget_bytes = 32 * 1024 * 1024
    bytes_per_row = 2 * 2 * d * 4
    tn_cap = max(8, (budget_bytes // bytes_per_row) // 8 * 8)
    tn = max(8, (min(tile_n, tn_cap) // 8) * 8)
    tn = min(tn, _round_up(n, 8))

    # Zero-pad N to a multiple of tn.  Zero rows contribute nothing to any raw
    # moment, and the true N is baked into the kernel, so this is exact.
    n_pad = _round_up(n, tn)
    if n_pad > n:
        pad = ((0, n_pad - n), (0, 0))
        prediction = jnp.pad(prediction, pad)
        ground_truth = jnp.pad(ground_truth, pad)
    grid = (n_pad // tn,)

    kernel = functools.partial(_ccc_loss_kernel, n_rows=n, d=d)

    out = pl.pallas_call(
        kernel,
        out_shape=jax.ShapeDtypeStruct((1, d), jnp.float32),
        grid_spec=pltpu.PrefetchScalarGridSpec(
            num_scalar_prefetch=0,
            grid=grid,
            in_specs=[
                pl.BlockSpec((tn, d), lambda i: (i, 0)),
                pl.BlockSpec((tn, d), lambda i: (i, 0)),
            ],
            out_specs=pl.BlockSpec((1, d), lambda i: (0, 0)),
            scratch_shapes=[pltpu.VMEM((1, d), jnp.float32)] * 5,
        ),
        compiler_params=pltpu.CompilerParams(
            dimension_semantics=("arbitrary",),      # reduction axis
            vmem_limit_bytes=64 * 1024 * 1024,
        ),
    )(prediction, ground_truth)
    return out[0]  # (D,) -- matches torch output shape input.shape[1:]


def _ccc_loss_ref(prediction, ground_truth):
    """Pure-JAX reference mirroring the PyTorch module exactly."""
    mean_gt = jnp.mean(ground_truth, axis=0)
    mean_pred = jnp.mean(prediction, axis=0)
    var_gt = jnp.var(ground_truth, axis=0, ddof=1)
    var_pred = jnp.var(prediction, axis=0, ddof=1)
    v_pred = prediction - mean_pred
    v_gt = ground_truth - mean_gt
    cor = jnp.sum(v_pred * v_gt) / (
        jnp.sqrt(jnp.sum(v_pred ** 2)) * jnp.sqrt(jnp.sum(v_gt ** 2))
    )
    sd_gt = jnp.std(ground_truth, ddof=1)
    sd_pred = jnp.std(prediction, ddof=1)
    numerator = 2 * cor * sd_gt * sd_pred
    denominator = var_gt + var_pred + (mean_gt - mean_pred) ** 2
    return 1 - numerator / denominator


if __name__ == "__main__":
    key = jax.random.PRNGKey(0)
    k1, k2, k3, k4 = jax.random.split(key, 4)

    # Case 1: small single-tile problem (grid of 1).
    N, D = 8, 32
    prediction = jax.random.normal(k1, (N, D), dtype=jnp.float32)
    ground_truth = jax.random.normal(k2, (N, D), dtype=jnp.float32) * 0.5 + 0.1
    out = jax.block_until_ready(ccc_loss(prediction, ground_truth))
    ref = jax.block_until_ready(_ccc_loss_ref(prediction, ground_truth))
    assert out.shape == (D,)
    assert jnp.allclose(out, ref, rtol=1e-4, atol=1e-4), (out, ref)

    # Case 2: multi-step grid with N-padding (N=20, tile=16 -> 2 grid steps),
    # exercising the moment accumulation + init/finalize path.
    N2, D2 = 20, 128
    pred2 = jax.random.normal(k3, (N2, D2), dtype=jnp.float32) + 0.3
    gt2 = jax.random.normal(k4, (N2, D2), dtype=jnp.float32) * 0.7 - 0.2
    out2 = jax.block_until_ready(ccc_loss(pred2, gt2, tile_n=16))
    ref2 = jax.block_until_ready(_ccc_loss_ref(pred2, gt2))
    assert out2.shape == (D2,)
    assert jnp.allclose(out2, ref2, rtol=1e-4, atol=1e-4), (out2, ref2)

    print("KERNEL_OK")
</pallas_src>

<mosaic_0001>
module attributes {stable_mosaic.version = 11 : i64} {
  func.func @_ccc_loss_kernel(%arg0: i32, %arg1: memref<8x32xf32, #tpu.memory_space<vmem>>, %arg2: memref<8x32xf32, #tpu.memory_space<vmem>>, %arg3: memref<1x32xf32, #tpu.memory_space<vmem>>, %arg4: memref<1x32xf32, #tpu.memory_space<vmem>>, %arg5: memref<1x32xf32, #tpu.memory_space<vmem>>, %arg6: memref<1x32xf32, #tpu.memory_space<vmem>>, %arg7: memref<1x32xf32, #tpu.memory_space<vmem>>, %arg8: memref<1x32xf32, #tpu.memory_space<vmem>>) attributes {dimension_semantics = [#tpu.dimension_semantics<arbitrary>], iteration_bounds = array<i64: 1>, scalar_prefetch = 0 : i64, scratch_operands = 5 : i64, tpu.core_type = #tpu.core_type<tc>, window_params = [{transform_indices = @transform_0, window_bounds = array<i64: 8, 32>}, {transform_indices = @transform_1, window_bounds = array<i64: 8, 32>}, {pipeline_mode = #tpu.pipeline_mode<synchronous>, transform_indices = @transform_2, window_bounds = array<i64: 1, 32>}]} {
    %c0_i32 = arith.constant 0 : i32
    %0 = arith.cmpi eq, %arg0, %c0_i32 : i32
    %1 = arith.extui %0 : i1 to i32
    %c0_i32_0 = arith.constant 0 : i32
    %2 = arith.cmpi ne, %1, %c0_i32_0 : i32
    scf.if %2 {
      %cst_30 = arith.constant 0.000000e+00 : f32
      %36 = vector.broadcast %cst_30 : f32 to vector<1x32xf32>
      %c0_31 = arith.constant 0 : index
      %c0_32 = arith.constant 0 : index
      %37 = vector.load %arg4[%c0_31, %c0_32] : memref<1x32xf32, #tpu.memory_space<vmem>>, vector<1x32xf32>
      tpu.vector_store %arg4[%c0_31, %c0_32], %36 {strides = array<i32>} : memref<1x32xf32, #tpu.memory_space<vmem>>, vector<1x32xf32>,
      %cst_33 = arith.constant 0.000000e+00 : f32
      %38 = vector.broadcast %cst_33 : f32 to vector<1x32xf32>
      %c0_34 = arith.constant 0 : index
      %c0_35 = arith.constant 0 : index
      %39 = vector.load %arg5[%c0_34, %c0_35] : memref<1x32xf32, #tpu.memory_space<vmem>>, vector<1x32xf32>
      tpu.vector_store %arg5[%c0_34, %c0_35], %38 {strides = array<i32>} : memref<1x32xf32, #tpu.memory_space<vmem>>, vector<1x32xf32>,
      %cst_36 = arith.constant 0.000000e+00 : f32
      %40 = vector.broadcast %cst_36 : f32 to vector<1x32xf32>
      %c0_37 = arith.constant 0 : index
      %c0_38 = arith.constant 0 : index
      %41 = vector.load %arg6[%c0_37, %c0_38] : memref<1x32xf32, #tpu.memory_space<vmem>>, vector<1x32xf32>
      tpu.vector_store %arg6[%c0_37, %c0_38], %40 {strides = array<i32>} : memref<1x32xf32, #tpu.memory_space<vmem>>, vector<1x32xf32>,
      %cst_39 = arith.constant 0.000000e+00 : f32
      %42 = vector.broadcast %cst_39 : f32 to vector<1x32xf32>
      %c0_40 = arith.constant 0 : index
      %c0_41 = arith.constant 0 : index
      %43 = vector.load %arg7[%c0_40, %c0_41] : memref<1x32xf32, #tpu.memory_space<vmem>>, vector<1x32xf32>
      tpu.vector_store %arg7[%c0_40, %c0_41], %42 {strides = array<i32>} : memref<1x32xf32, #tpu.memory_space<vmem>>, vector<1x32xf32>,
      %cst_42 = arith.constant 0.000000e+00 : f32
      %44 = vector.broadcast %cst_42 : f32 to vector<1x32xf32>
      %c0_43 = arith.constant 0 : index
      %c0_44 = arith.constant 0 : index
      %45 = vector.load %arg8[%c0_43, %c0_44] : memref<1x32xf32, #tpu.memory_space<vmem>>, vector<1x32xf32>
      tpu.vector_store %arg8[%c0_43, %c0_44], %44 {strides = array<i32>} : memref<1x32xf32, #tpu.memory_space<vmem>>, vector<1x32xf32>,
    } else {
    }
    %c0 = arith.constant 0 : index
    %c0_1 = arith.constant 0 : index
    %3 = vector.load %arg1[%c0, %c0_1] : memref<8x32xf32, #tpu.memory_space<vmem>>, vector<8x32xf32>
    %c0_2 = arith.constant 0 : index
    %c0_3 = arith.constant 0 : index
    %4 = vector.load %arg2[%c0_2, %c0_3] : memref<8x32xf32, #tpu.memory_space<vmem>>, vector<8x32xf32>
    %c0_4 = arith.constant 0 : index
    %c0_5 = arith.constant 0 : index
    %5 = vector.load %arg4[%c0_4, %c0_5] : memref<1x32xf32, #tpu.memory_space<vmem>>, vector<1x32xf32>
    %cst = arith.constant dense<0.000000e+00> : vector<32xf32>
    %6 = vector.multi_reduction <add>, %3, %cst [0] : vector<8x32xf32> to vector<32xf32>
    %7 = vector.shape_cast %6 : vector<32xf32> to vector<1x32xf32>
    %8 = arith.addf %5, %7 : vector<1x32xf32>
    %c0_6 = arith.constant 0 : index
    %c0_7 = arith.constant 0 : index
    %9 = vector.load %arg4[%c0_6, %c0_7] : memref<1x32xf32, #tpu.memory_space<vmem>>, vector<1x32xf32>
    tpu.vector_store %arg4[%c0_6, %c0_7], %8 {strides = array<i32>} : memref<1x32xf32, #tpu.memory_space<vmem>>, vector<1x32xf32>,
    %c0_8 = arith.constant 0 : index
    %c0_9 = arith.constant 0 : index
    %10 = vector.load %arg5[%c0_8, %c0_9] : memref<1x32xf32, #tpu.memory_space<vmem>>, vector<1x32xf32>
    %cst_10 = arith.constant dense<0.000000e+00> : vector<32xf32>
    %11 = vector.multi_reduction <add>, %4, %cst_10 [0] : vector<8x32xf32> to vector<32xf32>
    %12 = vector.shape_cast %11 : vector<32xf32> to vector<1x32xf32>
    %13 = arith.addf %10, %12 : vector<1x32xf32>
    %c0_11 = arith.constant 0 : index
    %c0_12 = arith.constant 0 : index
    %14 = vector.load %arg5[%c0_11, %c0_12] : memref<1x32xf32, #tpu.memory_space<vmem>>, vector<1x32xf32>
    tpu.vector_store %arg5[%c0_11, %c0_12], %13 {strides = array<i32>} : memref<1x32xf32, #tpu.memory_space<vmem>>, vector<1x32xf32>,
    %c0_13 = arith.constant 0 : index
    %c0_14 = arith.constant 0 : index
    %15 = vector.load %arg6[%c0_13, %c0_14] : memref<1x32xf32, #tpu.memory_space<vmem>>, vector<1x32xf32>
    %16 = arith.mulf %3, %3 : vector<8x32xf32>
    %cst_15 = arith.constant dense<0.000000e+00> : vector<32xf32>
    %17 = vector.multi_reduction <add>, %16, %cst_15 [0] : vector<8x32xf32> to vector<32xf32>
    %18 = vector.shape_cast %17 : vector<32xf32> to vector<1x32xf32>
    %19 = arith.addf %15, %18 : vector<1x32xf32>
    %c0_16 = arith.constant 0 : index
    %c0_17 = arith.constant 0 : index
    %20 = vector.load %arg6[%c0_16, %c0_17] : memref<1x32xf32, #tpu.memory_space<vmem>>, vector<1x32xf32>
    tpu.vector_store %arg6[%c0_16, %c0_17], %19 {strides = array<i32>} : memref<1x32xf32, #tpu.memory_space<vmem>>, vector<1x32xf32>,
    %c0_18 = arith.constant 0 : index
    %c0_19 = arith.constant 0 : index
    %21 = vector.load %arg7[%c0_18, %c0_19] : memref<1x32xf32, #tpu.memory_space<vmem>>, vector<1x32xf32>
    %22 = arith.mulf %4, %4 : vector<8x32xf32>
    %cst_20 = arith.constant dense<0.000000e+00> : vector<32xf32>
    %23 = vector.multi_reduction <add>, %22, %cst_20 [0] : vector<8x32xf32> to vector<32xf32>
    %24 = vector.shape_cast %23 : vector<32xf32> to vector<1x32xf32>
    %25 = arith.addf %21, %24 : vector<1x32xf32>
    %c0_21 = arith.constant 0 : index
    %c0_22 = arith.constant 0 : index
    %26 = vector.load %arg7[%c0_21, %c0_22] : memref<1x32xf32, #tpu.memory_space<vmem>>, vector<1x32xf32>
    tpu.vector_store %arg7[%c0_21, %c0_22], %25 {strides = array<i32>} : memref<1x32xf32, #tpu.memory_space<vmem>>, vector<1x32xf32>,
    %c0_23 = arith.constant 0 : index
    %c0_24 = arith.constant 0 : index
    %27 = vector.load %arg8[%c0_23, %c0_24] : memref<1x32xf32, #tpu.memory_space<vmem>>, vector<1x32xf32>
    %28 = arith.mulf %3, %4 : vector<8x32xf32>
    %cst_25 = arith.constant dense<0.000000e+00> : vector<32xf32>
    %29 = vector.multi_reduction <add>, %28, %cst_25 [0] : vector<8x32xf32> to vector<32xf32>
    %30 = vector.shape_cast %29 : vector<32xf32> to vector<1x32xf32>
    %31 = arith.addf %27, %30 : vector<1x32xf32>
    %c0_26 = arith.constant 0 : index
    %c0_27 = arith.constant 0 : index
    %32 = vector.load %arg8[%c0_26, %c0_27] : memref<1x32xf32, #tpu.memory_space<vmem>>, vector<1x32xf32>
    tpu.vector_store %arg8[%c0_26, %c0_27], %31 {strides = array<i32>} : memref<1x32xf32, #tpu.memory_space<vmem>>, vector<1x32xf32>,
    %c0_i32_28 = arith.constant 0 : i32
    %33 = arith.cmpi eq, %arg0, %c0_i32_28 : i32
    %34 = arith.extui %33 : i1 to i32
    %c0_i32_29 = arith.constant 0 : i32
    %35 = arith.cmpi ne, %34, %c0_i32_29 : i32
    scf.if %35 {
      %c0_30 = arith.constant 0 : index
      %c0_31 = arith.constant 0 : index
      %36 = vector.load %arg4[%c0_30, %c0_31] : memref<1x32xf32, #tpu.memory_space<vmem>>, vector<1x32xf32>
      %cst_32 = arith.constant 8.000000e+00 : f32
      %37 = vector.broadcast %cst_32 : f32 to vector<1x32xf32>
      %38 = arith.divf %36, %37 : vector<1x32xf32>
      %c0_33 = arith.constant 0 : index
      %c0_34 = arith.constant 0 : index
      %39 = vector.load %arg5[%c0_33, %c0_34] : memref<1x32xf32, #tpu.memory_space<vmem>>, vector<1x32xf32>
      %cst_35 = arith.constant 8.000000e+00 : f32
      %40 = vector.broadcast %cst_35 : f32 to vector<1x32xf32>
      %41 = arith.divf %39, %40 : vector<1x32xf32>
      %c0_36 = arith.constant 0 : index
      %c0_37 = arith.constant 0 : index
      %42 = vector.load %arg6[%c0_36, %c0_37] : memref<1x32xf32, #tpu.memory_space<vmem>>, vector<1x32xf32>
      %cst_38 = arith.constant 8.000000e+00 : f32
      %43 = vector.broadcast %cst_38 : f32 to vector<1x32xf32>
      %44 = arith.mulf %43, %38 : vector<1x32xf32>
      %45 = arith.mulf %44, %38 : vector<1x32xf32>
      %46 = arith.subf %42, %45 : vector<1x32xf32>
      %c0_39 = arith.constant 0 : index
      %c0_40 = arith.constant 0 : index
      %47 = vector.load %arg7[%c0_39, %c0_40] : memref<1x32xf32, #tpu.memory_space<vmem>>, vector<1x32xf32>
      %cst_41 = arith.constant 8.000000e+00 : f32
      %48 = vector.broadcast %cst_41 : f32 to vector<1x32xf32>
      %49 = arith.mulf %48, %41 : vector<1x32xf32>
      %50 = arith.mulf %49, %41 : vector<1x32xf32>
      %51 = arith.subf %47, %50 : vector<1x32xf32>
      %c0_42 = arith.constant 0 : index
      %c0_43 = arith.constant 0 : index
      %52 = vector.load %arg8[%c0_42, %c0_43] : memref<1x32xf32, #tpu.memory_space<vmem>>, vector<1x32xf32>
      %cst_44 = arith.constant 8.000000e+00 : f32
      %53 = vector.broadcast %cst_44 : f32 to vector<1x32xf32>
      %54 = arith.mulf %53, %38 : vector<1x32xf32>
      %55 = arith.mulf %54, %41 : vector<1x32xf32>
      %56 = arith.subf %52, %55 : vector<1x32xf32>
      %cst_45 = arith.constant 8.000000e+00 : f32
      %cst_46 = arith.constant 1.000000e+00 : f32
      %57 = arith.subf %cst_45, %cst_46 : f32
      %cst_47 = arith.constant 1.000000e+00 : f32
      %58 = arith.divf %cst_47, %57 : f32
      %59 = vector.broadcast %58 : f32 to vector<1x32xf32>
      %60 = arith.mulf %46, %59 : vector<1x32xf32>
      %61 = vector.broadcast %58 : f32 to vector<1x32xf32>
      %62 = arith.mulf %51, %61 : vector<1x32xf32>
      %63 = vector.shape_cast %46 : vector<1x32xf32> to vector<1x1x32xf32>
      %cst_48 = arith.constant dense<0.000000e+00> : vector<1xf32>
      %64 = vector.multi_reduction <add>, %63, %cst_48 [1, 2] : vector<1x1x32xf32> to vector<1xf32>
      %65 = vector.shape_cast %64 : vector<1xf32> to vector<1x1x1xf32>
      %66 = vector.extract %65[0, 0, 0] : f32 from vector<1x1x1xf32>
      %67 = vector.shape_cast %51 : vector<1x32xf32> to vector<1x1x32xf32>
      %cst_49 = arith.constant dense<0.000000e+00> : vector<1xf32>
      %68 = vector.multi_reduction <add>, %67, %cst_49 [1, 2] : vector<1x1x32xf32> to vector<1xf32>
      %69 = vector.shape_cast %68 : vector<1xf32> to vector<1x1x1xf32>
      %70 = vector.extract %69[0, 0, 0] : f32 from vector<1x1x1xf32>
      %71 = vector.shape_cast %56 : vector<1x32xf32> to vector<1x1x32xf32>
      %cst_50 = arith.constant dense<0.000000e+00> : vector<1xf32>
      %72 = vector.multi_reduction <add>, %71, %cst_50 [1, 2] : vector<1x1x32xf32> to vector<1xf32>
      %73 = vector.shape_cast %72 : vector<1xf32> to vector<1x1x1xf32>
      %74 = vector.extract %73[0, 0, 0] : f32 from vector<1x1x1xf32>
      %75 = arith.mulf %66, %70 : f32
      %76 = math.rsqrt %75 : f32
      %77 = arith.mulf %74, %76 : f32
      %c0_51 = arith.constant 0 : index
      %c0_52 = arith.constant 0 : index
      %78 = vector.load %arg4[%c0_51, %c0_52] : memref<1x32xf32, #tpu.memory_space<vmem>>, vector<1x32xf32>
      %79 = vector.shape_cast %78 : vector<1x32xf32> to vector<1x1x32xf32>
      %cst_53 = arith.constant dense<0.000000e+00> : vector<1xf32>
      %80 = vector.multi_reduction <add>, %79, %cst_53 [1, 2] : vector<1x1x32xf32> to vector<1xf32>
      %81 = vector.shape_cast %80 : vector<1xf32> to vector<1x1x1xf32>
      %82 = vector.extract %81[0, 0, 0] : f32 from vector<1x1x1xf32>
      %c0_54 = arith.constant 0 : index
      %c0_55 = arith.constant 0 : index
      %83 = vector.load %arg5[%c0_54, %c0_55] : memref<1x32xf32, #tpu.memory_space<vmem>>, vector<1x32xf32>
      %84 = vector.shape_cast %83 : vector<1x32xf32> to vector<1x1x32xf32>
      %cst_56 = arith.constant dense<0.000000e+00> : vector<1xf32>
      %85 = vector.multi_reduction <add>, %84, %cst_56 [1, 2] : vector<1x1x32xf32> to vector<1xf32>
      %86 = vector.shape_cast %85 : vector<1xf32> to vector<1x1x1xf32>
      %87 = vector.extract %86[0, 0, 0] : f32 from vector<1x1x1xf32>
      %c0_57 = arith.constant 0 : index
      %c0_58 = arith.constant 0 : index
      %88 = vector.load %arg6[%c0_57, %c0_58] : memref<1x32xf32, #tpu.memory_space<vmem>>, vector<1x32xf32>
      %89 = vector.shape_cast %88 : vector<1x32xf32> to vector<1x1x32xf32>
      %cst_59 = arith.constant dense<0.000000e+00> : vector<1xf32>
      %90 = vector.multi_reduction <add>, %89, %cst_59 [1, 2] : vector<1x1x32xf32> to vector<1xf32>
      %91 = vector.shape_cast %90 : vector<1xf32> to vector<1x1x1xf32>
      %92 = vector.extract %91[0, 0, 0] : f32 from vector<1x1x1xf32>
      %c0_60 = arith.constant 0 : index
      %c0_61 = arith.constant 0 : index
      %93 = vector.load %arg7[%c0_60, %c0_61] : memref<1x32xf32, #tpu.memory_space<vmem>>, vector<1x32xf32>
      %94 = vector.shape_cast %93 : vector<1x32xf32> to vector<1x1x32xf32>
      %cst_62 = arith.constant dense<0.000000e+00> : vector<1xf32>
      %95 = vector.multi_reduction <add>, %94, %cst_62 [1, 2] : vector<1x1x32xf32> to vector<1xf32>
      %96 = vector.shape_cast %95 : vector<1xf32> to vector<1x1x1xf32>
      %97 = vector.extract %96[0, 0, 0] : f32 from vector<1x1x1xf32>
      %cst_63 = arith.constant 2.560000e+02 : f32
      %98 = arith.divf %82, %cst_63 : f32
      %cst_64 = arith.constant 2.560000e+02 : f32
      %99 = arith.divf %87, %cst_64 : f32
      %cst_65 = arith.constant 2.560000e+02 : f32
      %cst_66 = arith.constant 1.000000e+00 : f32
      %100 = arith.subf %cst_65, %cst_66 : f32
      %cst_67 = arith.constant 1.000000e+00 : f32
      %101 = arith.divf %cst_67, %100 : f32
      %cst_68 = arith.constant 2.560000e+02 : f32
      %102 = arith.mulf %cst_68, %98 : f32
      %103 = arith.mulf %102, %98 : f32
      %104 = arith.subf %92, %103 : f32
      %105 = arith.mulf %104, %101 : f32
      %106 = math.sqrt %105 : f32
      %cst_69 = arith.constant 2.560000e+02 : f32
      %107 = arith.mulf %cst_69, %99 : f32
      %108 = arith.mulf %107, %99 : f32
      %109 = arith.subf %97, %108 : f32
      %110 = arith.mulf %109, %101 : f32
      %111 = math.sqrt %110 : f32
      %cst_70 = arith.constant 2.000000e+00 : f32
      %112 = arith.mulf %cst_70, %77 : f32
      %113 = arith.mulf %112, %111 : f32
      %114 = arith.mulf %113, %106 : f32
      %115 = arith.subf %41, %38 : vector<1x32xf32>
      %116 = arith.addf %62, %60 : vector<1x32xf32>
      %117 = arith.mulf %115, %115 : vector<1x32xf32>
      %118 = arith.addf %116, %117 : vector<1x32xf32>
      %119 = vector.broadcast %114 : f32 to vector<1x32xf32>
      %120 = arith.divf %119, %118 : vector<1x32xf32>
      %cst_71 = arith.constant 1.000000e+00 : f32
      %121 = vector.broadcast %cst_71 : f32 to vector<1x32xf32>
      %122 = arith.subf %121, %120 : vector<1x32xf32>
      %c0_72 = arith.constant 0 : index
      %c0_73 = arith.constant 0 : index
      %123 = vector.load %arg3[%c0_72, %c0_73] : memref<1x32xf32, #tpu.memory_space<vmem>>, vector<1x32xf32>
      tpu.vector_store %arg3[%c0_72, %c0_73], %122 {strides = array<i32>} : memref<1x32xf32, #tpu.memory_space<vmem>>, vector<1x32xf32>,
    } else {
    }
    return
  }
  func.func @transform_0(%arg0: i32) -> (i32, i32) {
    %c0_i32 = arith.constant 0 : i32
    %c0_i32_0 = arith.constant 0 : i32
    return %arg0, %c0_i32 : i32, i32
  }
  func.func @transform_1(%arg0: i32) -> (i32, i32) {
    %c0_i32 = arith.constant 0 : i32
    %c0_i32_0 = arith.constant 0 : i32
    return %arg0, %c0_i32 : i32, i32
  }
  func.func @transform_2(%arg0: i32) -> (i32, i32) {
    %c0_i32 = arith.constant 0 : i32
    %c0_i32_0 = arith.constant 0 : i32
    %c0_i32_1 = arith.constant 0 : i32
    return %c0_i32, %c0_i32_0 : i32, i32
  }
}

</mosaic_0001>

<bundles_post_ra>
// kernel: tpu_custom_call.1
= control target key start
LH: loop header
LB: loop body
LE: loop exit
PB: predicated region body
PF: predicated region fallthrough
CT: control target
= control target key end

     0   :  { %7 = vsyncpa [#allocation8], 0  ;;  %s420_s0 = inlined_call_operand.hbm [shape: f32[8,32], index: 0, kind: input, shape index: {}]   ;;  %s421_s1 = inlined_call_operand.hbm [shape: f32[8,32], index: 1, kind: input, shape index: {}]   ;;  %s422_s2 = inlined_call_operand.hbm [shape: f32[1,32], index: 2, kind: output, shape index: {}]  }
   0x1   :  { %8 = vsyncpa [#allocation11], 0 }
   0x2   :  { %9 = vsyncpa [#allocation9], 0  ;;  %s357_s9 = smov [#allocation7]   ;;  %s358_s11 = smov [#allocation10]  }
   0x3   :  { %s16_s10 = sshll.u32 %s357_s9, 4  ;;  %s26_s12 = sshll.u32 %s358_s11, 4  ;;  %s17_s10 = int_to_ptr.vmem [resolvable:$true] %s16_s10  ;;  %s27_s12 = int_to_ptr.vmem [resolvable:$true] %s26_s12 }
   0x4   :  { %s299_s13 = scalar_lea.vmem %s17_s10, 128  ;;  %p304_p1 = scmp.lt.s32.totalorder %s17_s10, %s17_s10 }
   0x5   :  { %p300_p0 = scmp.ne.s32.totalorder %s17_s10, %s299_s13  ;;  %p305_p2 = scmp.lt.s32.totalorder %s299_s13, %s299_s13 }
   0x7   :  { %p306_p3 = por %p305_p2, %p304_p1 }
   0x9   :  { %p307_p4 = pnand %p306_p3, %p300_p0 }
   0xb   :  { %310 = shalt.err (!%p307_p4)
}
   0xc   :  { %19 = dma.hbm_to_vmem [thread:$0]  %s420_s0, 128, %s17_s10, [#allocation8]  }
   0xd   :  { %s319_s16 = scalar_lea.vmem %s27_s12, 128  ;;  %p324_p6 = scmp.lt.s32.totalorder %s27_s12, %s27_s12 }
   0xe   :  { %p320_p5 = scmp.ne.s32.totalorder %s27_s12, %s319_s16  ;;  %p325_p7 = scmp.lt.s32.totalorder %s319_s16, %s319_s16 }
  0x10   :  { %p326_p8 = por %p325_p7, %p324_p6 }
  0x12   :  { %p327_p9 = pnand %p326_p8, %p320_p5 }
  0x14   :  { %330 = shalt.err (!%p327_p9)
}
  0x15   :  { %29 = dma.hbm_to_vmem [thread:$0]  %s421_s1, 128, %s27_s12, [#allocation11]  }
  0x16   :  { %351 = dma.done.wait [#allocation8], 128  }
  0x17   :  { %352 = vsyncadd [#allocation8], 4294967168 }
  0x18   :  { %353 = dma.done.wait [#allocation11], 128  }
  0x19   :  { %354 = vsyncadd [#allocation11], 4294967168  ;;  %vm40_vm0 = vcmask 253952   ;;  %v359_v0 = vmov 0.0   ;;  %vm49_vm1 = vcmask 261120   ;;  %v46_v1 = vld [vmem:[#allocation7] sm:$0xff] }
  0x1a   :  { %41 = vst.msk [vmem:[#allocation2] sm:$0x1] %vm40_vm0, %v359_v0  ;;  %43 = vst.msk [vmem:[#allocation4] sm:$0x1] %vm40_vm0, %v359_v0  ;;  %v47_v2 = vld [vmem:[#allocation10] sm:$0xff]  ;;  %v50_v3 = vsel %vm49_vm1, %v46_v1, 0.0  ;;  %v71_v4 = vmul.f32 %v46_v1, %v46_v1 }
  0x1b   :  { %42 = vst.msk [vmem:[#allocation3] sm:$0x1] %vm40_vm0, %v359_v0  ;;  %44 = vst.msk [vmem:[#allocation5] sm:$0x1] %vm40_vm0, %v359_v0  ;;  %v61_v5 = vsel %vm49_vm1, %v47_v2, 0.0  ;;  %v82_v6 = vmul.f32 %v47_v2, %v47_v2  ;;  %v51_v7 = vrot.slane %v50_v3, 4  ;;  %v93_v9 = vmul.f32 %v47_v2, %v46_v1 }
  0x1c   :  { %45 = vst.msk [vmem:[#allocation6] sm:$0x1] %vm40_vm0, %v359_v0  ;;  %v62_v8 = vrot.slane %v61_v5, 4  ;;  %v72_v10 = vsel %vm49_vm1, %v71_v4, 0.0  ;;  %s360_s14 = smov [#allocation12]  }
  0x1d   :  { %v83_v11 = vsel %vm49_vm1, %v82_v6, 0.0  ;;  %v52_v12 = vadd.f32 %v51_v7, %v50_v3  ;;  %v73_v13 = vrot.slane %v72_v10, 4  ;;  %v94_v16 = vsel %vm49_vm1, %v93_v9, 0.0  ;;  %s249_s15 = sshll.u32 %s360_s14, 4  ;;  %s250_s15 = int_to_ptr.vmem [resolvable:$true] %s249_s15 }
  0x1e   :  { %v63_v14 = vadd.f32 %v62_v8, %v61_v5  ;;  %v84_v15 = vrot.slane %v83_v11, 4  ;;  %v95_v21 = vrot.slane %v94_v16, 4  ;;  %s331_s16 = scalar_lea.vmem %s250_s15, 16  ;;  %s335_s17 = scalar_lea.vmem %s250_s15, 32 }
  0x1f   :  { %v53_v17 = vrot.slane %v52_v12, 2  ;;  %v74_v18 = vadd.f32 %v73_v13, %v72_v10  ;;  %p332_p10 = scmp.ne.s32.totalorder %s250_s15, %s331_s16  ;;  %p336_p11 = scmp.lt.s32.totalorder %s250_s15, %s250_s15 }
  0x20   :  { %v64_v19 = vrot.slane %v63_v14, 2  ;;  %v85_v20 = vadd.f32 %v84_v15, %v83_v11  ;;  %v96_v26 = vadd.f32 %v95_v21, %v94_v16  ;;  %p337_p12 = scmp.lt.s32.totalorder %s335_s17, %s331_s16 }
  0x21   :  { %v54_v22 = vadd.f32 %v53_v17, %v52_v12  ;;  %v75_v23 = vrot.slane %v74_v18, 2  ;;  %v48_v31 = vld [vmem:[#allocation2] sm:$0x1]  ;;  %v70_v38 = vld [vmem:[#allocation4] sm:$0x1] }
  0x22   :  { %v65_v24 = vadd.f32 %v64_v19, %v63_v14  ;;  %v86_v25 = vrot.slane %v85_v20, 2  ;;  %v60_v32 = vld [vmem:[#allocation3] sm:$0x1]  ;;  %v97_v33 = vrot.slane %v96_v26, 2  ;;  %v81_v39 = vld [vmem:[#allocation5] sm:$0x1]  ;;  %p338_p13 = por %p337_p12, %p336_p11 }
  0x23   :  { %v55_v27 = vrot.slane %v54_v22, 1  ;;  %v76_v28 = vadd.f32 %v75_v23, %v74_v18  ;;  %v92_v48 = vld [vmem:[#allocation6] sm:$0x1] }
  0x24   :  { %v66_v29 = vrot.slane %v65_v24, 1  ;;  %v87_v30 = vadd.f32 %v86_v25, %v85_v20  ;;  %v98_v40 = vadd.f32 %v97_v33, %v96_v26  ;;  %p339_p0 = pnand %p338_p13, %p332_p10 }
  0x25   :  { %v56_v34 = vadd.f32 %v55_v27, %v54_v22  ;;  %v77_v35 = vrot.slane %v76_v28, 1 }
  0x26   :  { %v67_v36 = vadd.f32 %v66_v29, %v65_v24  ;;  %v88_v37 = vrot.slane %v87_v30, 1  ;;  %v99_v45 = vrot.slane %v98_v40, 1 }
  0x27   :  { %v57_v41 = vadd.f32 %v56_v34, %v48_v31  ;;  %v78_v42 = vadd.f32 %v77_v35, %v76_v28 }
  0x28   :  { %v68_v43 = vadd.f32 %v67_v36, %v60_v32  ;;  %v89_v44 = vadd.f32 %v88_v37, %v87_v30  ;;  %v100_v49 = vadd.f32 %v99_v45, %v98_v40 }
  0x29   :  { %59 = vst.msk [vmem:[#allocation2] sm:$0x1] %vm40_vm0, %v57_v41  ;;  %v79_v46 = vadd.f32 %v78_v42, %v70_v38 }
  0x2a   :  { %69 = vst.msk [vmem:[#allocation3] sm:$0x1] %vm40_vm0, %v68_v43  ;;  %v90_v47 = vadd.f32 %v89_v44, %v81_v39  ;;  %v101_v50 = vadd.f32 %v100_v49, %v92_v48 }
  0x2b   :  { %80 = vst.msk [vmem:[#allocation4] sm:$0x1] %vm40_vm0, %v79_v46 }
  0x2c   :  { %91 = vst.msk [vmem:[#allocation5] sm:$0x1] %vm40_vm0, %v90_v47  ;;  %102 = vst.msk [vmem:[#allocation6] sm:$0x1] %vm40_vm0, %v101_v50 }
  0x30   :  { %v106_v51 = vld [vmem:[#allocation2] sm:$0x1] }
  0x31   :  { %v109_v52 = vld [vmem:[#allocation3] sm:$0x1]  ;;  %v108_v53 = vmul.f32 0.125, %v106_v51  ;;  %v159_v10 = vsel %vm40_vm0, %v106_v51, 0.0 }
  0x32   :  { %v110_v54 = vmul.f32 0.125, %v109_v52  ;;  %v111_v58 = vld [vmem:[#allocation4] sm:$0x1]  ;;  %v169_v12 = vsel %vm40_vm0, %v109_v52, 0.0 }
  0x33   :  { %v112_v55 = vmul.f32 8.0, %v108_v53  ;;  %v115_v59 = vld [vmem:[#allocation5] sm:$0x1]  ;;  %v119_v62 = vld [vmem:[#allocation6] sm:$0x1]  ;;  %v179_v13 = vsel %vm40_vm0, %v111_v58, 0.0 }
  0x34   :  { %v116_v56 = vmul.f32 8.0, %v110_v54  ;;  %v234_v57 = vsub.f32 %v110_v54, %v108_v53  ;;  %v189_v14 = vsel %vm40_vm0, %v115_v59, 0.0 }
  0x35   :  { %v113_v60 = vmul.f32 %v112_v55, %v108_v53  ;;  %v120_v63 = vmul.f32 %v112_v55, %v110_v54 }
  0x36   :  { %v117_v61 = vmul.f32 %v116_v56, %v110_v54  ;;  %v236_v6 = vmul.f32 %v234_v57, %v234_v57 }
  0x37   :  { %v114_v0 = vsub.f32 %v111_v58, %v113_v60  ;;  %v121_v2 = vsub.f32 %v119_v62, %v120_v63 }
  0x38   :  { %v118_v1 = vsub.f32 %v115_v59, %v117_v61 }
  0x39   :  { %v124_v3 = vsel %vm40_vm0, %v114_v0, 0.0  ;;  %v122_v4 = vmul.f32 0.14285715, %v114_v0  ;;  %v144_v7 = vsel %vm40_vm0, %v121_v2, 0.0 }
  0x3a   :  { %v123_v5 = vmul.f32 0.14285715, %v118_v1  ;;  %125 = vadd.xlane.f32.xlu0 %v124_v3  ;;  %v134_v8 = vsel %vm40_vm0, %v118_v1, 0.0  ;;  %145 = vadd.xlane.f32.xlu1 %v144_v7 }
  0x3c   :  { %v235_v9 = vadd.f32 %v123_v5, %v122_v4 }
  0x3e   :  { %v401_v11 = vadd.f32 %v236_v6, %v235_v9  ;;  %135 = vadd.xlane.f32.xlu0 %v134_v8  ;;  %160 = vadd.xlane.f32.xlu1 %v159_v10 }
  0x42   :  { %170 = vadd.xlane.f32.xlu0 %v169_v12  ;;  %180 = vadd.xlane.f32.xlu1 %v179_v13 }
  0x46   :  { %190 = vadd.xlane.f32.xlu0 %v189_v14 }
  0xc3   :  { %v126_v15 = vpop.xlane.xlu0 %125  ;;  %v146_v17 = vpop.xlane.xlu1 %145 }
  0xc4   :  { %v127_v16 = vrot.slane %v126_v15, 4  ;;  %v147_v18 = vrot.slane %v146_v17, 4 }
  0xc6   :  { %v128_v19 = vadd.f32 %v127_v16, %v126_v15  ;;  %v148_v21 = vadd.f32 %v147_v18, %v146_v17 }
  0xc7   :  { %v136_v20 = vpop.xlane.xlu0 %135  ;;  %v161_v36 = vpop.xlane.xlu1 %160 }
  0xc8   :  { %v129_v22 = vrot.slane %v128_v19, 2  ;;  %v137_v23 = vrot.slane %v136_v20, 4  ;;  %v149_v24 = vrot.slane %v148_v21, 2  ;;  %v162_v40 = vrot.slane %v161_v36, 4 }
  0xca   :  { %v138_v25 = vadd.f32 %v137_v23, %v136_v20  ;;  %v130_v26 = vadd.f32 %v129_v22, %v128_v19  ;;  %v150_v27 = vadd.f32 %v149_v24, %v148_v21  ;;  %v163_v44 = vadd.f32 %v162_v40, %v161_v36 }
  0xcb   :  { %v171_v37 = vpop.xlane.xlu0 %170  ;;  %v181_v38 = vpop.xlane.xlu1 %180 }
  0xcc   :  { %v139_v28 = vrot.slane %v138_v25, 2  ;;  %v131_v29 = vrot.slane %v130_v26, 1  ;;  %v151_v30 = vrot.slane %v150_v27, 1  ;;  %v182_v41 = vrot.slane %v181_v38, 4 }
  0xcd   :  { %v172_v42 = vrot.slane %v171_v37, 4  ;;  %v164_v49 = vrot.slane %v163_v44, 2 }
  0xce   :  { %v132_v31 = vadd.f32 %v131_v29, %v130_v26  ;;  %v140_v32 = vadd.f32 %v139_v28, %v138_v25  ;;  %v152_v34 = vadd.f32 %v151_v30, %v150_v27  ;;  %v183_v45 = vadd.f32 %v182_v41, %v181_v38 }
  0xcf   :  { %v191_v39 = vpop.xlane.xlu0 %190  ;;  %v173_v46 = vadd.f32 %v172_v42, %v171_v37  ;;  %v165_v54 = vadd.f32 %v164_v49, %v163_v44 }
  0xd0   :  { %259 = vpush %v132_v31  ;;  %v141_v33 = vrot.slane %v140_v32, 1  ;;  %v192_v43 = vrot.slane %v191_v39, 4  ;;  %v184_v50 = vrot.slane %v183_v45, 2 }
  0xd1   :  { %v174_v51 = vrot.slane %v173_v46, 2  ;;  %v166_v57 = vrot.slane %v165_v54, 1 }
  0xd2   :  { %v142_v35 = vadd.f32 %v141_v33, %v140_v32  ;;  %v193_v47 = vadd.f32 %v192_v43, %v191_v39  ;;  %v185_v53 = vadd.f32 %v184_v50, %v183_v45 }
  0xd3   :  { %v175_v56 = vadd.f32 %v174_v51, %v173_v46  ;;  %v167_v62 = vadd.f32 %v166_v57, %v165_v54 }
  0xd4   :  { %261 = vpush %v142_v35  ;;  %v194_v52 = vrot.slane %v193_v47, 2  ;;  %v186_v58 = vrot.slane %v185_v53, 1 }
  0xd5   :  { %263 = vpush %v152_v34  ;;  %v176_v59 = vrot.slane %v175_v56, 1 }
  0xd6   :  { %v195_v55 = vadd.f32 %v194_v52, %v193_v47  ;;  %v187_v63 = vadd.f32 %v186_v58, %v185_v53 }
  0xd7   :  { %v177_v0 = vadd.f32 %v176_v59, %v175_v56 }
  0xd8   :  { %v196_v60 = vrot.slane %v195_v55, 1 }
  0xda   :  { %v197_v1 = vadd.f32 %v196_v60, %v195_v55 }
 0x101   :  { %s260_s0 = spop %259 }
 0x105   :  { %s262_s1 = spop %261 }
 0x106   :  { %s154_s19 = smul.f32 %s262_s1, %s260_s0  ;;  %s406_s20 = spop %263 }
 0x108   :  { %v155_v48 = vstv %s154_s19 }
 0x109   :  { %283 = vrsqrt.f32 %v155_v48 }
 0x116   :  { %v284_v61 = vpop.eup %283 }
 0x117   :  { %265 = vpush %v284_v61 }
 0x118   :  { %267 = vpush %v167_v62 }
 0x119   :  { %269 = vpush %v177_v0 }
 0x11a   :  { %271 = vpush %v187_v63 }
 0x11b   :  { %273 = vpush %v197_v1 }
 0x148   :  { %s408_s21 = spop %265 }
 0x149   :  { %s158_s22 = smul.f32 %s408_s21, %s406_s20  ;;  %s268_s23 = spop %267 }
 0x14a   :  { %s201_s24 = smul.f32 0.00390625, %s268_s23  ;;  %s270_s25 = spop %269 }
 0x14b   :  { %s204_s27 = smul.f32 0.00390625, %s270_s25  ;;  %s272_s30 = spop %271 }
 0x14c   :  { %s205_s26 = smul.f32 256.0, %s201_s24  ;;  %s274_s6 = spop %273 }
 0x14d   :  { %s218_s29 = smul.f32 256.0, %s204_s27 }
 0x14e   :  { %s206_s28 = smul.f32 %s205_s26, %s201_s24 }
 0x14f   :  { %s219_s4 = smul.f32 %s218_s29, %s204_s27 }
 0x150   :  { %s207_s3 = ssub.f32 %s272_s30, %s206_s28  ;;  %s231_s10 = smul.f32 2.0, %s158_s22 }
 0x151   :  { %s220_s7 = ssub.f32 %s274_s6, %s219_s4 }
 0x152   :  { %s208_s5 = smul.f32 0.003921569, %s207_s3 }
 0x153   :  { %s221_s8 = smul.f32 0.003921569, %s220_s7 }
 0x154   :  { %v209_v2 = vstv %s208_s5 }
 0x155   :  { %285 = vrsqrt.f32 %v209_v2  ;;  %v222_v3 = vstv %s221_s8  ;;  %vm212_vm2 = vcmp.eq.f32.partialorder %v209_v2, inf  ;;  %v215_v6 = vand.u32 2147483648, %v209_v2 }
 0x156   :  { %287 = vrsqrt.f32 %v222_v3  ;;  %vm214_vm3 = vcmp.eq.f32.partialorder %v209_v2, 0.0  ;;  %vm225_vm4 = vcmp.eq.f32.partialorder %v222_v3, inf  ;;  %v228_v12 = vand.u32 2147483648, %v222_v3 }
 0x157   :  { %vm227_vm5 = vcmp.eq.f32.partialorder %v222_v3, 0.0  ;;  %289 = vrcp.f32 %v401_v11 }
 0x162   :  { %v286_v4 = vpop.eup %285 }
 0x163   :  { %v211_v5 = vmul.f32 %v286_v4, %v209_v2  ;;  %v288_v7 = vpop.eup %287 }
 0x164   :  { %v224_v10 = vmul.f32 %v288_v7, %v222_v3  ;;  %v290_v15 = vpop.eup %289 }
 0x165   :  { %v213_v8 = vsel %vm212_vm2, %v209_v2, %v211_v5 }
 0x166   :  { %v216_v9 = vsel %vm214_vm3, %v215_v6, %v213_v8  ;;  %v226_v13 = vsel %vm225_vm4, %v222_v3, %v224_v10 }
 0x167   :  { %275 = vpush %v216_v9  ;;  %v229_v14 = vsel %vm227_vm5, %v228_v12, %v226_v13 }
 0x168   :  { %277 = vpush %v229_v14 }
 0x198   :  { %s276_s9 = spop %275 }
 0x199   :  { %s278_s11 = spop %277 }
 0x19a   :  { %s232_s12 = smul.f32 %s278_s11, %s231_s10 }
 0x19c   :  { %s233_s13 = smul.f32 %s276_s9, %s232_s12 }
 0x19e   :  { %v238_v16 = vstv %s233_s13 }
 0x19f   :  { %v240_v17 = vmul.f32 %v290_v15, %v238_v16 }
 0x1a1   :  { %v241_v18 = vsub.f32 1.0, %v240_v17 }
 0x1a3   :  { %242 = vst.msk [vmem:[#allocation12] sm:$0x1] %vm40_vm0, %v241_v18 }
 0x1a4   :  { %342 = shalt.err (!%p339_p0)
}
 0x1a5   :  { %252 = dma.vmem_to_hbm [thread:$0]  %s250_s15, 16, %s422_s2, [#allocation9]  }
 0x1a6   :  { %355 = dma.done.wait [#allocation9], 16  }
 0x1a7   :  { %356 = vsyncadd [#allocation9], 4294967280 }
 0x1a8   :  { %256 = vsyncpa [#allocation8], 1 }
 0x1a9   :  { %257 = vsyncpa [#allocation11], 1 }
 0x1aa   :  { %258 = vsyncpa [#allocation9], 1 }

</bundles_post_ra>
